<compile_context>
chip_gen: v6e
topology: v6e:2x2x1
jax: 0.10.0
libtpu: 0.0.40
codegen_flags: <defaults>
</compile_context>

<pallas_src>
import math

import jax
import jax.numpy as jnp
from jax import lax
from jax.experimental import pallas as pl
from jax.experimental.pallas import tpu as pltpu


# ----------------------------- config -------------------------------------
class Config:
    image_size = 16
    patch_size = 8
    num_channels = 1
    context_dim = 16
    position_encoding_dim = 8
    hidden_size = 32          # nr_filters
    num_logistic_mix = 4
    num_res_layers = 1
    densenet_growth_rate = 4
    densenet_block_size = 2
    densenet_nblocks = 2
    densenet_ninit_features = 8
    densenet_compression = 0.5
    n_clusters = 8
    discretize_features = False


# --------------------------- in-kernel helpers ------------------------------
def _softplus(x):
    return jnp.maximum(x, 0.0) + jnp.log1p(jnp.exp(-jnp.abs(x)))


def _sigmoid_softplus(x):
    # shares exp(-|x|) between sigmoid and softplus; exact (not approx)
    # reciprocal because cdf_plus - cdf_min is differenced and logged later.
    e = jnp.exp(-jnp.abs(x))
    inv = 1.0 / (1.0 + e)
    sig = jnp.where(x >= 0.0, inv, e * inv)
    sp = jnp.maximum(x, 0.0) + jnp.log1p(e)
    return sig, sp


# --------------------------- wrapper helpers --------------------------------
def patch_img(imgs, patch_size):
    B, C, H, W = imgs.shape
    ph, pw = H // patch_size, W // patch_size
    x = imgs.reshape(B, C, ph, patch_size, pw, patch_size)
    # (B, ph, pw, C, ps, ps)  -- same as the PyTorch permute(0, 2, 4, 1, 3, 5)
    return jnp.transpose(x, (0, 2, 4, 1, 3, 5))


def make_params(cfg):
    key = jax.random.PRNGKey(0)
    ks = jax.random.split(key, 8)
    ps, C = cfg.patch_size, cfg.num_channels
    d_in = C * ps * ps
    ctx_total = cfg.context_dim + cfg.position_encoding_dim
    nmix = cfg.num_logistic_mix
    n_out = 3 * nmix
    num_patches = (cfg.image_size // cfg.patch_size) ** 2

    w1 = jax.random.normal(ks[2], (C + ctx_total, cfg.hidden_size), jnp.float32) * 0.1
    w2 = jax.random.normal(ks[3], (cfg.hidden_size, n_out), jnp.float32) * 0.1

    # Head weights pre-split so the fused kernel never has to do lane concat:
    #   concat([x, ctx, pos], 1) @ w1 == x * w1_x + ctx @ w1_ctx + pos @ w1_pos
    return dict(
        w_enc=jax.random.normal(ks[0], (d_in, cfg.context_dim), jnp.float32) * 0.05,
        b_enc=jnp.zeros((1, cfg.context_dim), jnp.float32),
        bn_gamma=jnp.ones((1, cfg.context_dim), jnp.float32),
        bn_beta=jnp.zeros((1, cfg.context_dim), jnp.float32),
        pos_enc=jax.random.uniform(
            ks[1], (num_patches, cfg.position_encoding_dim), jnp.float32),
        w1_x=w1[0:C, :],
        w1_ctx=w1[C:C + cfg.context_dim, :],
        w1_pos=w1[C + cfg.context_dim:, :],
        b1=jnp.zeros((1, cfg.hidden_size), jnp.float32),
        w2_logit=w2[:, 0:nmix],
        w2_mu=w2[:, nmix:2 * nmix],
        w2_ls=w2[:, 2 * nmix:3 * nmix],
        b2_logit=jnp.zeros((1, nmix), jnp.float32),
        b2_mu=jnp.zeros((1, nmix), jnp.float32),
        b2_ls=jnp.zeros((1, nmix), jnp.float32),
    )


# ------------------------------ forward -------------------------------------
def self_contextual_vit_forward(imgs, params, cfg, sample_key):
    B, C = imgs.shape[0], imgs.shape[1]
    ps = cfg.patch_size
    pp = ps * ps
    nmix = cfg.num_logistic_mix
    nmix_pad = ((nmix + 7) // 8) * 8          # pad mixture groups to vreg rows
    ctx_dim = cfg.context_dim
    pos_dim = cfg.position_encoding_dim
    hidden = cfg.hidden_size
    num_patches = (cfg.image_size // ps) ** 2

    # TODO(synk): the stand-in per-pixel head assumes num_channels == 1 (as in
    # the provided config); a multi-channel DMOL head needs a channel axis.
    assert C == 1

    # ---- patchify + flatten(0, 2) (data prep, XLA) ----
    patched = patch_img(imgs, ps).reshape(-1, C * pp)      # (n_total, pp)
    n_total = patched.shape[0]

    # ---- weighted sampling without replacement (weights = arange) ----
    weights = jnp.arange(n_total, dtype=jnp.float32)
    p = weights / jnp.sum(weights)
    idxs = jax.random.choice(sample_key, n_total, shape=(B,),
                             replace=False, p=p).astype(jnp.int32)
    idx_rows = jnp.stack([idxs, idxs % num_patches], axis=0).astype(jnp.int32)

    # ---- one-time layout prep (tiny XLA ops, weights stored transposed/bf16)
    bf16 = jnp.bfloat16
    x_allT = patched.T                                   # (pp, n_total) f32
    pos_encT = params["pos_enc"].T                       # (pos_dim, num_patches)
    w_encT = params["w_enc"].T.astype(bf16)              # (ctx_dim, pp)
    w1_ctxT = params["w1_ctx"].T.astype(bf16)            # (hidden, ctx_dim)
    w1_posT = params["w1_pos"].T.astype(bf16)            # (hidden, pos_dim)

    def pad_grp(w):                                      # (hidden, nmix) -> (nmix_pad, hidden)
        return jnp.pad(w.T, ((0, nmix_pad - nmix), (0, 0)))

    # fused + group-padded second head layer: [logit | mu | log_scale]
    w2T = jnp.concatenate([pad_grp(params["w2_logit"]),
                           pad_grp(params["w2_mu"]),
                           pad_grp(params["w2_ls"])], axis=0).astype(bf16)

    def pad_col(v, n):
        v = jnp.asarray(v, jnp.float32).reshape(-1)
        return jnp.pad(v, (0, n - v.shape[0]))

    b2_packed = jnp.concatenate([pad_col(params["b2_logit"], nmix_pad),
                                 pad_col(params["b2_mu"], nmix_pad),
                                 pad_col(params["b2_ls"], nmix_pad)])
    n_rows = max(hidden, ctx_dim, 3 * nmix_pad)
    # all tiny per-channel vectors packed into one (n_rows, 8) slab (1 DMA)
    col_slab = jnp.stack([pad_col(params["b_enc"], n_rows),     # col 0
                          pad_col(params["bn_gamma"], n_rows),  # col 1
                          pad_col(params["bn_beta"], n_rows),   # col 2
                          pad_col(params["b1"], n_rows),        # col 3
                          pad_col(params["w1_x"], n_rows),      # col 4
                          pad_col(b2_packed, n_rows),           # col 5
                          jnp.zeros((n_rows,), jnp.float32),
                          jnp.zeros((n_rows,), jnp.float32)], axis=1)

    # bpd = -mean_b(total_ll_b) / ln2 / C / ps / ps
    bpd_scale = -1.0 / (B * math.log(2.0) * C * ps * ps)
    log_127_5 = math.log(127.5)
    f32 = jnp.float32
    bl = B * pp                       # lane width of the batched per-pixel slab

    def fused_kernel(idx_ref, xT_ref, posT_ref, wencT_ref, w1cT_ref, w1pT_ref,
                     w2T_ref, slab_ref, o_ref):
        # ---- in-kernel gather of the B sampled patches (transposed layout,
        #      batch on lanes; no XLA gather, no per-b loop) -----------------
        row_i = lax.broadcasted_iota(jnp.int32, (n_total, B), 0)
        selT = (row_i == idx_ref[0:1, :]).astype(f32)              # (n_total, B)
        row_p = lax.broadcasted_iota(jnp.int32, (num_patches, B), 0)
        selpT = (row_p == idx_ref[1:2, :]).astype(f32)             # (num_patches, B)

        x_selT = jnp.dot(xT_ref[...], selT,
                         preferred_element_type=f32)               # (pp, B)
        pos_selT = jnp.dot(posT_ref[...], selpT,
                           preferred_element_type=f32)             # (pos_dim, B)

        # ---- packed small params (one slab load, static slices) -----------
        slab = slab_ref[...]
        b_enc_c = slab[0:ctx_dim, 0:1]
        gamma_c = slab[0:ctx_dim, 1:2]
        beta_c = slab[0:ctx_dim, 2:3]
        b1_c = slab[0:hidden, 3:4]
        w1x_c = slab[0:hidden, 4:5]
        b2_c = slab[0:3 * nmix_pad, 5:6]

        # ---- context encoder + BatchNorm1d (training-mode batch stats) ----
        # TODO(synk): full DenseNet (dense blocks / transitions) not
        # reproduced; stand-in is a linear projection to context_dim.
        featT = jnp.dot(wencT_ref[...], x_selT.astype(jnp.bfloat16),
                        preferred_element_type=f32) + b_enc_c       # (ctx_dim, B)
        mu = jnp.mean(featT, axis=1, keepdims=True)
        var = jnp.mean((featT - mu) ** 2, axis=1, keepdims=True)
        ctxT = (featT - mu) * lax.rsqrt(var + 1e-5) * gamma_c + beta_c

        # TODO(synk): NearestEmbed vector quantization skipped
        # (cfg.discretize_features = False).

        # context + position contribution of the head's first layer
        # (== concat([ctx, pos]) @ w1[1:], kept transposed: (hidden, B))
        c_preT = (jnp.dot(w1cT_ref[...], ctxT.astype(jnp.bfloat16),
                          preferred_element_type=f32)
                  + jnp.dot(w1pT_ref[...], pos_selT.astype(jnp.bfloat16),
                            preferred_element_type=f32)
                  + b1_c)                                            # (hidden, B)

        # ---- expand per-sample quantities to the lane-dense (., B*pp) layout
        lane_j = lax.broadcasted_iota(jnp.int32, (B, bl), 1)
        row_b = lax.broadcasted_iota(jnp.int32, (B, bl), 0)
        lo = row_b * pp
        e_blk = ((lane_j >= lo) & (lane_j < lo + pp)).astype(f32)    # (B, B*pp)

        c_exp = jnp.dot(c_preT, e_blk, preferred_element_type=f32)   # (hidden, B*pp)
        x_exp = jnp.dot(x_selT, e_blk, preferred_element_type=f32)   # (pp, B*pp)

        # x_row[0, b*pp + p] = x_selT[p, b]: pixel values, pixels on lanes.
        sub_p = lax.broadcasted_iota(jnp.int32, (pp, bl), 0)
        lane_p = lax.broadcasted_iota(jnp.int32, (pp, bl), 1)
        m = lane_p == sub_p
        for b in range(1, B):      # O(B) static compares (layout bookkeeping only)
            m = m | (lane_p == sub_p + b * pp)
        x_row = jnp.sum(jnp.where(m, x_exp, 0.0), axis=0, keepdims=True)  # (1, B*pp)

        # ---- per-pixel conditional model (batched, lane-dense) ------------
        # TODO(synk): masked/gated ResNet stack of ContextualPixelCNN not
        # reproduced; stand-in is a per-pixel conditional MLP (1x1 convs).
        h = jnp.maximum(w1x_c * x_row + c_exp, 0.0)                  # (hidden, B*pp)
        out_t = jnp.dot(w2T_ref[...], h.astype(jnp.bfloat16),
                        preferred_element_type=f32) + b2_c           # (3*nmix_pad, B*pp)

        # vreg-aligned static splits of the fused head output
        logit_raw = out_t[0:nmix_pad, :]
        means = out_t[nmix_pad:2 * nmix_pad, :]
        log_scales = jnp.maximum(out_t[2 * nmix_pad:3 * nmix_pad, :], -7.0)
        mix_row = lax.broadcasted_iota(jnp.int32, (nmix_pad, bl), 0)
        logit_probs = jnp.where(mix_row < nmix, logit_raw, -1e30)    # mask pad mixes

        # ---- discretized mixture-of-logistics log-likelihood --------------
        centered = x_row - means
        inv_stdv = jnp.exp(-log_scales)
        plus_in = inv_stdv * (centered + 1.0 / 255.0)
        min_in = inv_stdv * (centered - 1.0 / 255.0)
        cdf_plus, sp_plus = _sigmoid_softplus(plus_in)
        cdf_min, sp_min = _sigmoid_softplus(min_in)
        log_cdf_plus = plus_in - sp_plus
        log_one_minus_cdf_min = -sp_min
        cdf_delta = cdf_plus - cdf_min
        mid_in = inv_stdv * centered
        log_pdf_mid = mid_in - log_scales - 2.0 * _softplus(mid_in)

        inner = jnp.where(cdf_delta > 1e-5,
                          jnp.log(jnp.maximum(cdf_delta, 1e-12)),
                          log_pdf_mid - log_127_5)
        log_probs = jnp.where(x_row < -0.999, log_cdf_plus,
                              jnp.where(x_row > 0.999,
                                        log_one_minus_cdf_min, inner))

        # mixture log-softmax folded into the final LSE:
        #   ll = logsumexp(log_probs + logits) - logsumexp(logits)
        z = log_probs + logit_probs
        m1 = jnp.max(z, axis=0, keepdims=True)
        lse_num = m1 + jnp.log(jnp.sum(jnp.exp(z - m1), axis=0, keepdims=True))
        m2 = jnp.max(logit_probs, axis=0, keepdims=True)
        lse_den = m2 + jnp.log(jnp.sum(jnp.exp(logit_probs - m2),
                                       axis=0, keepdims=True))
        total_ll = jnp.sum(lse_num - lse_den)

        # bits/dim; single tiny output tile is the only HBM write.
        o_ref[...] = (total_ll * bpd_scale).reshape(1, 1)

    # NOTE: at production sizes, add a batch-blocked "parallel" grid (v7x has
    # 2 TensorCores / 64 MiB VMEM) and replace the one-hot-matmul gather with
    # a PrefetchScalarGridSpec / DMA row gather.  At these toy shapes (all
    # inputs < 20 KiB) a single gridless invocation is optimal.
    vmem = pl.BlockSpec(memory_space=pltpu.MemorySpace.VMEM)
    out = pl.pallas_call(
        fused_kernel,
        out_shape=jax.ShapeDtypeStruct((1, 1), jnp.float32),
        in_specs=[vmem] * 8,
        out_specs=vmem,
    )(idx_rows, x_allT, pos_encT, w_encT, w1_ctxT, w1_posT, w2T, col_slab)

    return out[0, 0]


# ------------------------------ main ----------------------------------------
if __name__ == "__main__":
    cfg = Config()
    params = make_params(cfg)

    key = jax.random.PRNGKey(0)
    k_img, k_sample = jax.random.split(key)
    imgs = jax.random.uniform(
        k_img, (2, cfg.num_channels, cfg.image_size, cfg.image_size),
        dtype=jnp.float32, minval=-1.0, maxval=1.0)

    bpd = self_contextual_vit_forward(imgs, params, cfg, k_sample)
    bpd = jax.block_until_ready(bpd)
    assert jnp.isfinite(bpd)
    print("KERNEL_OK")
</pallas_src>

<mosaic_0001>
module attributes {stable_mosaic.version = 11 : i64} {
  func.func @fused_kernel(%arg0: memref<2x2xi32, #tpu.memory_space<vmem>>, %arg1: memref<64x8xf32, #tpu.memory_space<vmem>>, %arg2: memref<8x4xf32, #tpu.memory_space<vmem>>, %arg3: memref<16x64xbf16, #tpu.memory_space<vmem>>, %arg4: memref<32x16xbf16, #tpu.memory_space<vmem>>, %arg5: memref<32x8xbf16, #tpu.memory_space<vmem>>, %arg6: memref<24x32xbf16, #tpu.memory_space<vmem>>, %arg7: memref<32x8xf32, #tpu.memory_space<vmem>>, %arg8: memref<1x1xf32, #tpu.memory_space<vmem>>) attributes {dimension_semantics = [], scalar_prefetch = 0 : i64, scratch_operands = 0 : i64, tpu.core_type = #tpu.core_type<tc>} {
    %0 = tpu.iota {dimensions = array<i32: 0>} : vector<8x2xi32>
    %c0 = arith.constant 0 : index
    %c0_0 = arith.constant 0 : index
    %1 = vector.load %arg0[%c0, %c0_0] : memref<2x2xi32, #tpu.memory_space<vmem>>, vector<1x2xi32>
    %2 = vector.broadcast %1 : vector<1x2xi32> to vector<8x2xi32>
    %3 = arith.cmpi eq, %0, %2 : vector<8x2xi32>
    %4 = arith.extui %3 : vector<8x2xi1> to vector<8x2xi32>
    %5 = arith.sitofp %4 : vector<8x2xi32> to vector<8x2xf32>
    %6 = tpu.iota {dimensions = array<i32: 0>} : vector<4x2xi32>
    %c1 = arith.constant 1 : index
    %c0_1 = arith.constant 0 : index
    %7 = vector.load %arg0[%c1, %c0_1] : memref<2x2xi32, #tpu.memory_space<vmem>>, vector<1x2xi32>
    %8 = vector.broadcast %7 : vector<1x2xi32> to vector<4x2xi32>
    %9 = arith.cmpi eq, %6, %8 : vector<4x2xi32>
    %10 = arith.extui %9 : vector<4x2xi1> to vector<4x2xi32>
    %11 = arith.sitofp %10 : vector<4x2xi32> to vector<4x2xf32>
    %c0_2 = arith.constant 0 : index
    %c0_3 = arith.constant 0 : index
    %12 = vector.load %arg1[%c0_2, %c0_3] : memref<64x8xf32, #tpu.memory_space<vmem>>, vector<64x8xf32>
    %cst = arith.constant dense<0.000000e+00> : vector<64x2xf32>
    %13 = tpu.matmul %12, %5, %cst {dimension_numbers = #tpu.dot_dimension_numbers<[1], [0], [0], [1], [0, 0, 1, 1], [], []>} : vector<64x8xf32>, vector<8x2xf32>, vector<64x2xf32> -> vector<64x2xf32>
    %c0_4 = arith.constant 0 : index
    %c0_5 = arith.constant 0 : index
    %14 = vector.load %arg2[%c0_4, %c0_5] : memref<8x4xf32, #tpu.memory_space<vmem>>, vector<8x4xf32>
    %cst_6 = arith.constant dense<0.000000e+00> : vector<8x2xf32>
    %15 = tpu.matmul %14, %11, %cst_6 {dimension_numbers = #tpu.dot_dimension_numbers<[1], [0], [0], [1], [0, 0, 1, 1], [], []>} : vector<8x4xf32>, vector<4x2xf32>, vector<8x2xf32> -> vector<8x2xf32>
    %c0_7 = arith.constant 0 : index
    %c0_8 = arith.constant 0 : index
    %16 = vector.load %arg7[%c0_7, %c0_8] : memref<32x8xf32, #tpu.memory_space<vmem>>, vector<32x8xf32>
    %17 = vector.extract_strided_slice %16 {offsets = [0, 0], sizes = [16, 1], strides = [1, 1]} : vector<32x8xf32> to vector<16x1xf32>
    %18 = vector.extract_strided_slice %16 {offsets = [0, 1], sizes = [16, 1], strides = [1, 1]} : vector<32x8xf32> to vector<16x1xf32>
    %19 = vector.extract_strided_slice %16 {offsets = [0, 2], sizes = [16, 1], strides = [1, 1]} : vector<32x8xf32> to vector<16x1xf32>
    %20 = vector.extract_strided_slice %16 {offsets = [0, 3], sizes = [32, 1], strides = [1, 1]} : vector<32x8xf32> to vector<32x1xf32>
    %21 = vector.extract_strided_slice %16 {offsets = [0, 4], sizes = [32, 1], strides = [1, 1]} : vector<32x8xf32> to vector<32x1xf32>
    %22 = vector.extract_strided_slice %16 {offsets = [0, 5], sizes = [24, 1], strides = [1, 1]} : vector<32x8xf32> to vector<24x1xf32>
    %c0_9 = arith.constant 0 : index
    %c0_10 = arith.constant 0 : index
    %23 = vector.load %arg3[%c0_9, %c0_10] : memref<16x64xbf16, #tpu.memory_space<vmem>>, vector<16x64xbf16>
    %24 = arith.truncf %13 : vector<64x2xf32> to vector<64x2xbf16>
    %cst_11 = arith.constant dense<0.000000e+00> : vector<16x2xf32>
    %25 = tpu.matmul %23, %24, %cst_11 {dimension_numbers = #tpu.dot_dimension_numbers<[1], [0], [0], [1], [0, 0, 1, 1], [], []>} : vector<16x64xbf16>, vector<64x2xbf16>, vector<16x2xf32> -> vector<16x2xf32>
    %26 = vector.broadcast %17 : vector<16x1xf32> to vector<16x2xf32>
    %27 = arith.addf %25, %26 : vector<16x2xf32>
    %cst_12 = arith.constant dense<0.000000e+00> : vector<16xf32>
    %28 = vector.multi_reduction <add>, %27, %cst_12 [1] : vector<16x2xf32> to vector<16xf32>
    %29 = vector.shape_cast %28 : vector<16xf32> to vector<16x1xf32>
    %cst_13 = arith.constant 2.000000e+00 : f32
    %30 = vector.broadcast %cst_13 : f32 to vector<16x1xf32>
    %31 = arith.divf %29, %30 : vector<16x1xf32>
    %32 = vector.broadcast %31 : vector<16x1xf32> to vector<16x2xf32>
    %33 = arith.subf %27, %32 : vector<16x2xf32>
    %34 = arith.mulf %33, %33 : vector<16x2xf32>
    %cst_14 = arith.constant dense<0.000000e+00> : vector<16xf32>
    %35 = vector.multi_reduction <add>, %34, %cst_14 [1] : vector<16x2xf32> to vector<16xf32>
    %36 = vector.shape_cast %35 : vector<16xf32> to vector<16x1xf32>
    %cst_15 = arith.constant 2.000000e+00 : f32
    %37 = vector.broadcast %cst_15 : f32 to vector<16x1xf32>
    %38 = arith.divf %36, %37 : vector<16x1xf32>
    %39 = vector.broadcast %31 : vector<16x1xf32> to vector<16x2xf32>
    %40 = arith.subf %27, %39 : vector<16x2xf32>
    %cst_16 = arith.constant 9.99999974E-6 : f32
    %41 = vector.broadcast %cst_16 : f32 to vector<16x1xf32>
    %42 = arith.addf %38, %41 : vector<16x1xf32>
    %43 = math.rsqrt %42 : vector<16x1xf32>
    %44 = vector.broadcast %43 : vector<16x1xf32> to vector<16x2xf32>
    %45 = arith.mulf %40, %44 : vector<16x2xf32>
    %46 = vector.broadcast %18 : vector<16x1xf32> to vector<16x2xf32>
    %47 = arith.mulf %45, %46 : vector<16x2xf32>
    %48 = vector.broadcast %19 : vector<16x1xf32> to vector<16x2xf32>
    %49 = arith.addf %47, %48 : vector<16x2xf32>
    %c0_17 = arith.constant 0 : index
    %c0_18 = arith.constant 0 : index
    %50 = vector.load %arg4[%c0_17, %c0_18] : memref<32x16xbf16, #tpu.memory_space<vmem>>, vector<32x16xbf16>
    %51 = arith.truncf %49 : vector<16x2xf32> to vector<16x2xbf16>
    %cst_19 = arith.constant dense<0.000000e+00> : vector<32x2xf32>
    %52 = tpu.matmul %50, %51, %cst_19 {dimension_numbers = #tpu.dot_dimension_numbers<[1], [0], [0], [1], [0, 0, 1, 1], [], []>} : vector<32x16xbf16>, vector<16x2xbf16>, vector<32x2xf32> -> vector<32x2xf32>
    %c0_20 = arith.constant 0 : index
    %c0_21 = arith.constant 0 : index
    %53 = vector.load %arg5[%c0_20, %c0_21] : memref<32x8xbf16, #tpu.memory_space<vmem>>, vector<32x8xbf16>
    %54 = arith.truncf %15 : vector<8x2xf32> to vector<8x2xbf16>
    %cst_22 = arith.constant dense<0.000000e+00> : vector<32x2xf32>
    %55 = tpu.matmul %53, %54, %cst_22 {dimension_numbers = #tpu.dot_dimension_numbers<[1], [0], [0], [1], [0, 0, 1, 1], [], []>} : vector<32x8xbf16>, vector<8x2xbf16>, vector<32x2xf32> -> vector<32x2xf32>
    %56 = arith.addf %52, %55 : vector<32x2xf32>
    %57 = vector.broadcast %20 : vector<32x1xf32> to vector<32x2xf32>
    %58 = arith.addf %56, %57 : vector<32x2xf32>
    %59 = tpu.iota {dimensions = array<i32: 1>} : vector<2x128xi32>
    %60 = tpu.iota {dimensions = array<i32: 0>} : vector<2x128xi32>
    %c64_i32 = arith.constant 64 : i32
    %61 = vector.broadcast %c64_i32 : i32 to vector<2x128xi32>
    %62 = arith.muli %60, %61 : vector<2x128xi32>
    %63 = arith.cmpi sge, %59, %62 : vector<2x128xi32>
    %c64_i32_23 = arith.constant 64 : i32
    %64 = vector.broadcast %c64_i32_23 : i32 to vector<2x128xi32>
    %65 = arith.addi %62, %64 : vector<2x128xi32>
    %66 = arith.cmpi slt, %59, %65 : vector<2x128xi32>
    %67 = arith.andi %63, %66 : vector<2x128xi1>
    %68 = arith.extui %67 : vector<2x128xi1> to vector<2x128xi32>
    %69 = arith.sitofp %68 : vector<2x128xi32> to vector<2x128xf32>
    %cst_24 = arith.constant dense<0.000000e+00> : vector<32x128xf32>
    %70 = tpu.matmul %58, %69, %cst_24 {dimension_numbers = #tpu.dot_dimension_numbers<[1], [0], [0], [1], [0, 0, 1, 1], [], []>} : vector<32x2xf32>, vector<2x128xf32>, vector<32x128xf32> -> vector<32x128xf32>
    %cst_25 = arith.constant dense<0.000000e+00> : vector<64x128xf32>
    %71 = tpu.matmul %13, %69, %cst_25 {dimension_numbers = #tpu.dot_dimension_numbers<[1], [0], [0], [1], [0, 0, 1, 1], [], []>} : vector<64x2xf32>, vector<2x128xf32>, vector<64x128xf32> -> vector<64x128xf32>
    %72 = tpu.iota {dimensions = array<i32: 0>} : vector<64x128xi32>
    %73 = tpu.iota {dimensions = array<i32: 1>} : vector<64x128xi32>
    %74 = arith.cmpi eq, %73, %72 : vector<64x128xi32>
    %c64_i32_26 = arith.constant 64 : i32
    %75 = vector.broadcast %c64_i32_26 : i32 to vector<64x128xi32>
    %76 = arith.addi %72, %75 : vector<64x128xi32>
    %77 = arith.cmpi eq, %73, %76 : vector<64x128xi32>
    %78 = arith.ori %74, %77 : vector<64x128xi1>
    %cst_27 = arith.constant 0.000000e+00 : f32
    %79 = vector.broadcast %cst_27 : f32 to vector<64x128xf32>
    %80 = arith.select %78, %71, %79 : vector<64x128xi1>, vector<64x128xf32>
    %cst_28 = arith.constant dense<0.000000e+00> : vector<128xf32>
    %81 = vector.multi_reduction <add>, %80, %cst_28 [0] : vector<64x128xf32> to vector<128xf32>
    %82 = vector.shape_cast %81 : vector<128xf32> to vector<1x128xf32>
    %83 = vector.broadcast %21 : vector<32x1xf32> to vector<32x128xf32>
    %84 = vector.broadcast %82 : vector<1x128xf32> to vector<32x128xf32>
    %85 = arith.mulf %83, %84 : vector<32x128xf32>
    %86 = arith.addf %85, %70 : vector<32x128xf32>
    %cst_29 = arith.constant 0.000000e+00 : f32
    %87 = vector.broadcast %cst_29 : f32 to vector<32x128xf32>
    %88 = arith.maximumf %86, %87 : vector<32x128xf32>
    %c0_30 = arith.constant 0 : index
    %c0_31 = arith.constant 0 : index
    %89 = vector.load %arg6[%c0_30, %c0_31] : memref<24x32xbf16, #tpu.memory_space<vmem>>, vector<24x32xbf16>
    %90 = arith.truncf %88 : vector<32x128xf32> to vector<32x128xbf16>
    %cst_32 = arith.constant dense<0.000000e+00> : vector<24x128xf32>
    %91 = tpu.matmul %89, %90, %cst_32 {dimension_numbers = #tpu.dot_dimension_numbers<[1], [0], [0], [1], [0, 0, 1, 1], [], []>} : vector<24x32xbf16>, vector<32x128xbf16>, vector<24x128xf32> -> vector<24x128xf32>
    %92 = vector.broadcast %22 : vector<24x1xf32> to vector<24x128xf32>
    %93 = arith.addf %91, %92 : vector<24x128xf32>
    %94 = vector.extract_strided_slice %93 {offsets = [0, 0], sizes = [8, 128], strides = [1, 1]} : vector<24x128xf32> to vector<8x128xf32>
    %95 = vector.extract_strided_slice %93 {offsets = [8, 0], sizes = [8, 128], strides = [1, 1]} : vector<24x128xf32> to vector<8x128xf32>
    %96 = vector.extract_strided_slice %93 {offsets = [16, 0], sizes = [8, 128], strides = [1, 1]} : vector<24x128xf32> to vector<8x128xf32>
    %cst_33 = arith.constant -7.000000e+00 : f32
    %97 = vector.broadcast %cst_33 : f32 to vector<8x128xf32>
    %98 = arith.maximumf %96, %97 : vector<8x128xf32>
    %99 = tpu.iota {dimensions = array<i32: 0>} : vector<8x128xi32>
    %c4_i32 = arith.constant 4 : i32
    %100 = vector.broadcast %c4_i32 : i32 to vector<8x128xi32>
    %101 = arith.cmpi slt, %99, %100 : vector<8x128xi32>
    %cst_34 = arith.constant -1.000000e+30 : f32
    %102 = vector.broadcast %cst_34 : f32 to vector<8x128xf32>
    %103 = arith.select %101, %94, %102 : vector<8x128xi1>, vector<8x128xf32>
    %104 = vector.broadcast %82 : vector<1x128xf32> to vector<8x128xf32>
    %105 = arith.subf %104, %95 : vector<8x128xf32>
    %cst_35 = arith.constant 0.000000e+00 : f32
    %106 = vector.broadcast %cst_35 : f32 to vector<8x128xf32>
    %107 = arith.subf %106, %98 : vector<8x128xf32>
    %108 = math.exp %107 : vector<8x128xf32>
    %cst_36 = arith.constant 0.00392156886 : f32
    %109 = vector.broadcast %cst_36 : f32 to vector<8x128xf32>
    %110 = arith.addf %105, %109 : vector<8x128xf32>
    %111 = arith.mulf %108, %110 : vector<8x128xf32>
    %cst_37 = arith.constant 0.00392156886 : f32
    %112 = vector.broadcast %cst_37 : f32 to vector<8x128xf32>
    %113 = arith.subf %105, %112 : vector<8x128xf32>
    %114 = arith.mulf %108, %113 : vector<8x128xf32>
    %115 = math.absf %111 : vector<8x128xf32>
    %cst_38 = arith.constant 0.000000e+00 : f32
    %116 = vector.broadcast %cst_38 : f32 to vector<8x128xf32>
    %117 = arith.subf %116, %115 : vector<8x128xf32>
    %118 = math.exp %117 : vector<8x128xf32>
    %cst_39 = arith.constant 1.000000e+00 : f32
    %119 = vector.broadcast %cst_39 : f32 to vector<8x128xf32>
    %120 = arith.addf %119, %118 : vector<8x128xf32>
    %cst_40 = arith.constant 1.000000e+00 : f32
    %121 = vector.broadcast %cst_40 : f32 to vector<8x128xf32>
    %122 = arith.divf %121, %120 : vector<8x128xf32>
    %cst_41 = arith.constant 0.000000e+00 : f32
    %123 = vector.broadcast %cst_41 : f32 to vector<8x128xf32>
    %124 = arith.cmpf oge, %111, %123 : vector<8x128xf32>
    %125 = arith.mulf %118, %122 : vector<8x128xf32>
    %126 = arith.select %124, %122, %125 : vector<8x128xi1>, vector<8x128xf32>
    %cst_42 = arith.constant 0.000000e+00 : f32
    %127 = vector.broadcast %cst_42 : f32 to vector<8x128xf32>
    %128 = arith.maximumf %111, %127 : vector<8x128xf32>
    %129 = math.log1p %118 : vector<8x128xf32>
    %130 = arith.addf %128, %129 : vector<8x128xf32>
    %131 = math.absf %114 : vector<8x128xf32>
    %cst_43 = arith.constant 0.000000e+00 : f32
    %132 = vector.broadcast %cst_43 : f32 to vector<8x128xf32>
    %133 = arith.subf %132, %131 : vector<8x128xf32>
    %134 = math.exp %133 : vector<8x128xf32>
    %cst_44 = arith.constant 1.000000e+00 : f32
    %135 = vector.broadcast %cst_44 : f32 to vector<8x128xf32>
    %136 = arith.addf %135, %134 : vector<8x128xf32>
    %cst_45 = arith.constant 1.000000e+00 : f32
    %137 = vector.broadcast %cst_45 : f32 to vector<8x128xf32>
    %138 = arith.divf %137, %136 : vector<8x128xf32>
    %cst_46 = arith.constant 0.000000e+00 : f32
    %139 = vector.broadcast %cst_46 : f32 to vector<8x128xf32>
    %140 = arith.cmpf oge, %114, %139 : vector<8x128xf32>
    %141 = arith.mulf %134, %138 : vector<8x128xf32>
    %142 = arith.select %140, %138, %141 : vector<8x128xi1>, vector<8x128xf32>
    %cst_47 = arith.constant 0.000000e+00 : f32
    %143 = vector.broadcast %cst_47 : f32 to vector<8x128xf32>
    %144 = arith.maximumf %114, %143 : vector<8x128xf32>
    %145 = math.log1p %134 : vector<8x128xf32>
    %146 = arith.addf %144, %145 : vector<8x128xf32>
    %147 = arith.subf %111, %130 : vector<8x128xf32>
    %cst_48 = arith.constant 0.000000e+00 : f32
    %148 = vector.broadcast %cst_48 : f32 to vector<8x128xf32>
    %149 = arith.subf %148, %146 : vector<8x128xf32>
    %150 = arith.subf %126, %142 : vector<8x128xf32>
    %151 = arith.mulf %108, %105 : vector<8x128xf32>
    %152 = arith.subf %151, %98 : vector<8x128xf32>
    %cst_49 = arith.constant 0.000000e+00 : f32
    %153 = vector.broadcast %cst_49 : f32 to vector<8x128xf32>
    %154 = arith.maximumf %151, %153 : vector<8x128xf32>
    %155 = math.absf %151 : vector<8x128xf32>
    %cst_50 = arith.constant 0.000000e+00 : f32
    %156 = vector.broadcast %cst_50 : f32 to vector<8x128xf32>
    %157 = arith.subf %156, %155 : vector<8x128xf32>
    %158 = math.exp %157 : vector<8x128xf32>
    %159 = math.log1p %158 : vector<8x128xf32>
    %160 = arith.addf %154, %159 : vector<8x128xf32>
    %cst_51 = arith.constant 2.000000e+00 : f32
    %161 = vector.broadcast %cst_51 : f32 to vector<8x128xf32>
    %162 = arith.mulf %161, %160 : vector<8x128xf32>
    %163 = arith.subf %152, %162 : vector<8x128xf32>
    %cst_52 = arith.constant 9.99999974E-6 : f32
    %164 = vector.broadcast %cst_52 : f32 to vector<8x128xf32>
    %165 = arith.cmpf ogt, %150, %164 : vector<8x128xf32>
    %cst_53 = arith.constant 9.99999996E-13 : f32
    %166 = vector.broadcast %cst_53 : f32 to vector<8x128xf32>
    %167 = arith.maximumf %150, %166 : vector<8x128xf32>
    %168 = math.log %167 : vector<8x128xf32>
    %cst_54 = arith.constant 4.8481164 : f32
    %169 = vector.broadcast %cst_54 : f32 to vector<8x128xf32>
    %170 = arith.subf %163, %169 : vector<8x128xf32>
    %171 = arith.select %165, %168, %170 : vector<8x128xi1>, vector<8x128xf32>
    %cst_55 = arith.constant -9.990000e-01 : f32
    %172 = vector.broadcast %cst_55 : f32 to vector<1x128xf32>
    %173 = arith.cmpf olt, %82, %172 : vector<1x128xf32>
    %cst_56 = arith.constant 9.990000e-01 : f32
    %174 = vector.broadcast %cst_56 : f32 to vector<1x128xf32>
    %175 = arith.cmpf ogt, %82, %174 : vector<1x128xf32>
    %176 = vector.shape_cast %175 : vector<1x128xi1> to vector<1x128xi1>
    %177 = vector.broadcast %176 : vector<1x128xi1> to vector<8x128xi1>
    %178 = arith.select %177, %149, %171 : vector<8x128xi1>, vector<8x128xf32>
    %179 = vector.shape_cast %173 : vector<1x128xi1> to vector<1x128xi1>
    %180 = vector.broadcast %179 : vector<1x128xi1> to vector<8x128xi1>
    %181 = arith.select %180, %147, %178 : vector<8x128xi1>, vector<8x128xf32>
    %182 = arith.addf %181, %103 : vector<8x128xf32>
    %cst_57 = arith.constant dense<0xFF800000> : vector<128xf32>
    %183 = vector.multi_reduction <maximumf>, %182, %cst_57 [0] : vector<8x128xf32> to vector<128xf32>
    %184 = vector.shape_cast %183 : vector<128xf32> to vector<1x128xf32>
    %185 = vector.broadcast %184 : vector<1x128xf32> to vector<8x128xf32>
    %186 = arith.subf %182, %185 : vector<8x128xf32>
    %187 = math.exp %186 : vector<8x128xf32>
    %cst_58 = arith.constant dense<0.000000e+00> : vector<128xf32>
    %188 = vector.multi_reduction <add>, %187, %cst_58 [0] : vector<8x128xf32> to vector<128xf32>
    %189 = vector.shape_cast %188 : vector<128xf32> to vector<1x128xf32>
    %190 = math.log %189 : vector<1x128xf32>
    %191 = arith.addf %184, %190 : vector<1x128xf32>
    %cst_59 = arith.constant dense<0xFF800000> : vector<128xf32>
    %192 = vector.multi_reduction <maximumf>, %103, %cst_59 [0] : vector<8x128xf32> to vector<128xf32>
    %193 = vector.shape_cast %192 : vector<128xf32> to vector<1x128xf32>
    %194 = vector.broadcast %193 : vector<1x128xf32> to vector<8x128xf32>
    %195 = arith.subf %103, %194 : vector<8x128xf32>
    %196 = math.exp %195 : vector<8x128xf32>
    %cst_60 = arith.constant dense<0.000000e+00> : vector<128xf32>
    %197 = vector.multi_reduction <add>, %196, %cst_60 [0] : vector<8x128xf32> to vector<128xf32>
    %198 = vector.shape_cast %197 : vector<128xf32> to vector<1x128xf32>
    %199 = math.log %198 : vector<1x128xf32>
    %200 = arith.addf %193, %199 : vector<1x128xf32>
    %201 = arith.subf %191, %200 : vector<1x128xf32>
    %202 = vector.shape_cast %201 : vector<1x128xf32> to vector<1x1x128xf32>
    %cst_61 = arith.constant dense<0.000000e+00> : vector<1xf32>
    %203 = vector.multi_reduction <add>, %202, %cst_61 [1, 2] : vector<1x1x128xf32> to vector<1xf32>
    %204 = vector.shape_cast %203 : vector<1xf32> to vector<1x1x1xf32>
    %205 = vector.extract %204[0, 0, 0] : f32 from vector<1x1x1xf32>
    %cst_62 = arith.constant -0.0112710549 : f32
    %206 = arith.mulf %205, %cst_62 : f32
    %207 = vector.broadcast %206 : f32 to vector<1x1xf32>
    %c0_63 = arith.constant 0 : index
    %c0_64 = arith.constant 0 : index
    %208 = vector.load %arg8[%c0_63, %c0_64] : memref<1x1xf32, #tpu.memory_space<vmem>>, vector<1x1xf32>
    tpu.vector_store %arg8[%c0_63, %c0_64], %207 {strides = array<i32>} : memref<1x1xf32, #tpu.memory_space<vmem>>, vector<1x1xf32>,
    return
  }
}

</mosaic_0001>

<bundles_post_ra>
// kernel: tpu_custom_call.1
= control target key start
LH: loop header
LB: loop body
LE: loop exit
PB: predicated region body
PF: predicated region fallthrough
CT: control target
= control target key end

     0   :  { %v31_v0 = vlaneseq  ;;  %vm57_vm0 = vcmask 64512   ;;  %v1354_v6 = vmov 1.0   ;;  %s1615_s0 = inlined_call_operand.vmem [shape: s32[2,2], index: 0, kind: input, shape index: {}]   ;;  %s1616_s1 = inlined_call_operand.vmem [shape: f32[64,8], index: 1, kind: input, shape index: {}]   ;;  %s1617_s2 = inlined_call_operand.vmem [shape: f32[8,4], index: 2, kind: input, shape index: {}]   ;;  %s1618_s3 = inlined_call_operand.vmem [shape: bf16[16,64], index: 3, kind: input, shape index: {}]   ;;  %s1619_s4 = inlined_call_operand.vmem [shape: bf16[32,16], index: 4, kind: input, shape index: {}]   ;;  %s1620_s5 = inlined_call_operand.vmem [shape: bf16[32,8], index: 5, kind: input, shape index: {}]   ;;  %s1621_s6 = inlined_call_operand.vmem [shape: bf16[24,32], index: 6, kind: input, shape index: {}]   ;;  %s1622_s7 = inlined_call_operand.vmem [shape: f32[32,8], index: 7, kind: input, shape index: {}]   ;;  %s1623_s8 = inlined_call_operand.hbm [shape: f32[1,1], index: 8, kind: output, shape index: {}]  }
   0x1   :  { %v49_v1 = vld [vmem:[%s1616_s1] sm:$0xff]  ;;  %v50_v4 = vld [vmem:[%s1616_s1 + $0x8] sm:$0xff]  ;;  %v51_v5 = vld [vmem:[%s1616_s1 + $0x10] sm:$0xff] }
   0x2   :  { %v1113_v2 = vld [vmem:[%s1615_s0] ss:$0 sm:$0xff]  ;;  %1201 = vmatprep.mubr.msk.f32.mxu0 %vm57_vm0, %v49_v1  ;;  %v1416_v3 = vshrl.u32 %v31_v0, 7 }
   0x4   :  { %vm38_vm1 = vcmp.eq.s32.totalorder %v1416_v3, %v1113_v2 }
   0x5   :  { %1199 = vmatprep.subr.msk.mxu0 %vm38_vm1, %v1354_v6 }
   0x6   :  { %1200 = vmatpush3.msk.msra.mxu0 %vm38_vm1, %v1354_v6 }
   0x7   :  { %1202 = vmatmul.mubr.msk.f32.vlgmr.msra.gmra.mxu0 %vm57_vm0, %v50_v4 }
   0x8   :  { %13 = vsyncpa [#allocation3], 0  ;;  %1204 = vmatprep.mubr.msk.f32.mxu0 %vm57_vm0, %v51_v5  ;;  %v52_v7 = vld [vmem:[%s1616_s1 + $0x18] sm:$0xff]  ;;  %v53_v8 = vld [vmem:[%s1616_s1 + $0x20] sm:$0xff]  ;;  %v1355_v12 = vmov 0.0   ;;  %vm1356_vm2 = vmmov 0  }
   0x9   :  { %v54_v9 = vld [vmem:[%s1616_s1 + $0x28] sm:$0xff]  ;;  %v55_v10 = vld [vmem:[%s1616_s1 + $0x30] sm:$0xff]  ;;  %v56_v11 = vld [vmem:[%s1616_s1 + $0x38] sm:$0xff]  ;;  %1218 = vmatprep.subr.bf16.mxu0 %v1355_v12  ;;  %1213 = vmatprep.subr.mxu1 %v1355_v12  ;;  %v1357_v14 = vmov 0   ;;  %v552_v23 = vmul.u32 64, %v1416_v3  ;;  %v1460_v26 = vand.u32 127, %v31_v0 }
   0xa   :  { %1215 = vmatprep.mubr.msk.f32.mxu1 %vm1356_vm2, %v1355_v12  ;;  %v1450_v13 = vld [vmem:[%s1622_s7] sm:$0xff]  ;;  %1285 = vset.pattern.permute.xlu0 %v1357_v14  ;;  %v1456_v15 = vld [vmem:[%s1622_s7 + $0x8] sm:$0xff]  ;;  %vm571_vm6 = vcmask 1041408   ;;  %vm291_vm7 = vcmask 523264   ;;  %vm336_vm8 = vcmask 15360   ;;  %vm192_vm9 = vcmask 1043456  }
   0xb   :  { %1205 = vmatmul.mubr.msk.f32.gmra.mxu0 %vm57_vm0, %v52_v7  ;;  %278 = vperm.xlu0 %1285, %v1450_v13   ;;  %v554_v27 = vadd.s32 64, %v552_v23  ;;  %vm553_vm3 = vcmp.ge.s32.totalorder %v1460_v26, %v552_v23  ;;  %v1293_v32 = vld [vmem:[%s1618_s3] sm:$0xff]   ;;  %v1358_v34 = vmov 1   ;;  %vm188_vm11 = vcmask 31744   ;;  %v1504_v63 = vld [vmem:[%s1622_s7 + $0x10] sm:$0xff]  ;;  %v1295_v1 = vld [vmem:[%s1620_s5 + $0x8] sm:$0xff]  }
   0xc   :  { %1207 = vmatprep.mubr.msk.f32.mxu0 %vm57_vm0, %v53_v8  ;;  %v1115_v33 = vld [vmem:[%s1615_s0 + $0x1] ss:$0 sm:$0xff]  ;;  %1286 = vset.pattern.permute.xlu1 %v1358_v34  ;;  %v1359_v47 = vmov 2   ;;  %v1360_v48 = vmov 3   ;;  %v269_v2 = vld [vmem:[%s1622_s7 + $0x18] sm:$0xff]  ;;  %v1361_v4 = vmov 4   ;;  %vm796_vm14 = vcmp.eq.s32.totalorder %v1460_v26, %v1416_v3 }
   0xd   :  { %vm555_vm4 = vcmp.lt.s32.totalorder %v1460_v26, %v554_v27  ;;  %vm46_vm10 = vcmp.eq.s32.totalorder %v1416_v3, %v1115_v33  ;;  %v187_v35 = vld [vmem:[%s1617_s2] sm:$0xff]  ;;  %vm472_vm12 = vcmask 130048   ;;  %vm902_vm13 = vcmask 261120  }
   0xe   :  { %vm556_vm5 = vmand %vm553_vm3, %vm555_vm4  ;;  %v1116_v36 = vsel %vm46_vm10, 1.0, %v1355_v12  ;;  %v1294_v0 = vld [vmem:[%s1620_s5] sm:$0xff]  }
   0xf   :  { %1208 = vmatmul.mubr.msk.f32.gmra.mxu0 %vm57_vm0, %v54_v9  ;;  %283 = vperm.xlu0 %1285, %v1456_v15   ;;  %v1464_v31 = vsel %vm556_vm5, 1.0, %v1355_v12  ;;  %v1296_v5 = vld [vmem:[%s1619_s4] sm:$0xff]  }
  0x10   :  { %1210 = vmatprep.mubr.msk.f32.mxu0 %vm57_vm0, %v55_v10  ;;  %1214 = vmatpush3.msk.msra.mxu1 %vm192_vm9, %v1116_v36 }
  0x11   :  { %1216 = vmatmul.mubr.msk.f32.vlgmr.msra.gmra.mxu1 %vm188_vm11, %v187_v35 }
  0x12   :  { %1232 = vmatprep.mubr.msk.bf16.mxu1 %vm57_vm0, %v1294_v0 }
  0x13   :  { %1211 = vmatmul.mubr.msk.f32.gmra.mxu0 %vm57_vm0, %v56_v11  ;;  %1288 = vset.pattern.permute.xlu0 %v1360_v48 }
  0x14   :  { %1226 = vmatprep.mubr.msk.bf16.mxu0 %vm1356_vm2, %v1355_v12 }
  0x86   :  { %v279_v37 = vpop.permute.xlu0 %278 }
  0x8a   :  { %v284_v42 = vpop.permute.xlu0 %283 }
  0xc7   :  { %v1203_v16 = vpop.f32.mrf.mxu0 }
  0xc9   :  { %v148_v17 = vpop.f32.mrf.mxu0 }
  0xca   :  { %v272_v30 = vpack.c.bf16 %v1203_v16, %v148_v17 }
  0xcb   :  { %v1206_v18 = vpop.f32.mrf.mxu0 }
  0xcd   :  { %v158_v19 = vpop.f32.mrf.mxu0 }
  0xce   :  { %v273_v29 = vpack.c.bf16 %v1206_v18, %v158_v19 }
  0xcf   :  { %v1209_v20 = vpop.f32.mrf.mxu0 }
  0xd1   :  { %v168_v21 = vpop.f32.mrf.mxu0  ;;  %v262_v59 = vpop.f32.mrf.mxu1 }
  0xd2   :  { %v274_v28 = vpack.c.bf16 %v1209_v20, %v168_v21  ;;  %v393_v60 = vpack.c.bf16 %v262_v59, %v262_v59 }
  0xd3   :  { %v1212_v22 = vpop.f32.mrf.mxu0  ;;  %v1217_v61 = vpop.f32.mrf.mxu1 }
  0xd4   :  { %v411_v62 = vsel %vm192_vm9, %v393_v60, 0  ;;  %1272 = vmatprep.subr.msk.bf16.mxu1 %vm192_vm9, %v393_v60 }
  0xd5   :  { %v178_v24 = vpop.f32.mrf.mxu0  ;;  %1231 = vmatpush3.bf16.msra.mxu1 %v411_v62 }
  0xd6   :  { %v275_v25 = vpack.c.bf16 %v1212_v22, %v178_v24 }
  0xd8   :  { %1219 = vmatpush3.bf16.msra.mxu0 %v275_v25  ;;  %1233 = vmatmul.mubr.msk.bf16.vlgmr.msra.gmra.mxu1 %vm57_vm0, %v1295_v1  ;;  %v793_v1 = vadd.s32 40, %v1416_v3 }
  0xd9   :  { %1220 = vmatprep.subr.bf16.mxu0 %v1355_v12  ;;  %1238 = vmatprep.mubr.msk.bf16.mxu1 %vm472_vm12, %v1296_v5  ;;  %v794_v5 = vadd.s32 48, %v1416_v3 }
  0xdc   :  { %1221 = vmatpush3.bf16.msra.mxu0 %v274_v28  ;;  %v1297_v28 = vld [vmem:[%s1619_s4 + $0x8] sm:$0xff]  }
  0xdd   :  { %1222 = vmatprep.subr.bf16.mxu0 %v1355_v12 }
  0xe0   :  { %1223 = vmatpush3.bf16.msra.mxu0 %v273_v29 }
  0xe1   :  { %1224 = vmatprep.subr.bf16.mxu0 %v1355_v12 }
  0xe4   :  { %1225 = vmatpush3.bf16.msra.mxu0 %v272_v30 }
  0xe5   :  { %1250 = vmatprep.subr.msk.mxu0 %vm571_vm6, %v1464_v31 }
  0xe7   :  { %1227 = vmatmul.mubr.msk.bf16.vlgmr.msra.gmra.mxu0 %vm291_vm7, %v1293_v32 }
  0xe8   :  { %1252 = vmatprep.mubr.msk.f32.mxu0 %vm336_vm8, %v148_v17  ;;  %1251 = vmatpush3.msk.msra.mxu0 %vm571_vm6, %v1464_v31 }
  0xef   :  { %1253 = vmatmul.mubr.msk.f32.vlgmr.msra.gmra.mxu0 %vm336_vm8, %v1203_v16 }
  0xf0   :  { %1255 = vmatprep.mubr.msk.f32.mxu0 %vm336_vm8, %v158_v19 }
  0xf3   :  { %1256 = vmatmul.mubr.msk.f32.gmra.mxu0 %vm336_vm8, %v1206_v18 }
  0xf4   :  { %1258 = vmatprep.mubr.msk.f32.mxu0 %vm336_vm8, %v168_v21 }
  0xf7   :  { %1259 = vmatmul.mubr.msk.f32.gmra.mxu0 %vm336_vm8, %v1209_v20 }
  0xf8   :  { %1261 = vmatprep.mubr.msk.f32.mxu0 %vm336_vm8, %v178_v24 }
  0xfb   :  { %1262 = vmatmul.mubr.msk.f32.gmra.mxu0 %vm336_vm8, %v1212_v22 }
 0x198   :  { %v1234_v29 = vpop.f32.mrf.mxu1 }
 0x19a   :  { %v447_v30 = vpop.f32.mrf.mxu1 }
 0x19c   :  { %v1235_v32 = vpop.f32.mrf.mxu1 }
 0x19e   :  { %v450_v33 = vpop.f32.mrf.mxu1 }
 0x1a7   :  { %v329_v38 = vpop.f32.mrf.mxu0 }
 0x1a8   :  { %v330_v39 = vadd.f32 %v329_v38, %v279_v37 }
 0x1a9   :  { %v1228_v40 = vpop.f32.mrf.mxu0 }
 0x1aa   :  { %v337_v41 = vsel %vm336_vm8, %v330_v39, 0.0 }
 0x1ab   :  { %338 = vadd.xlane.f32.xlu1 %v337_v41  ;;  %v332_v43 = vpop.f32.mrf.mxu0 }
 0x1ac   :  { %v333_v44 = vadd.f32 %v332_v43, %v284_v42 }
 0x1ad   :  { %v1229_v45 = vpop.f32.mrf.mxu0 }
 0x1ae   :  { %v340_v46 = vsel %vm336_vm8, %v333_v44, 0.0 }
 0x1af   :  { %341 = vadd.xlane.f32.xlu1 %v340_v46 }
 0x1c0   :  { %365 = vperm.xlu1 %1286, %v1450_v13  }
 0x1c4   :  { %369 = vperm.xlu1 %1286, %v1456_v15  }
 0x1c8   :  { %1287 = vset.pattern.permute.xlu1 %v1359_v47 }
 0x1c9   :  { %375 = vperm.xlu1 %1287, %v1450_v13  }
 0x234   :  { %v339_v49 = vpop.xlane.xlu1 %338 }
 0x235   :  { %v344_v50 = vmul.f32 0.5, %v339_v49  ;;  %v1298_v49 = vld [vmem:[%s1621_s6] sm:$0xff]  }
 0x237   :  { %v346_v51 = vsub.f32 %v330_v39, %v344_v50  ;;  %v1362_v50 = vmov 5  }
 0x238   :  { %v342_v52 = vpop.xlane.xlu1 %341 }
 0x239   :  { %v345_v53 = vmul.f32 0.5, %v342_v52  ;;  %v348_v54 = vmul.f32 %v346_v51, %v346_v51  ;;  %v789_v52 = vadd.s32 8, %v1416_v3 }
 0x23b   :  { %v347_v55 = vsub.f32 %v333_v44, %v345_v53  ;;  %v350_v56 = vsel %vm336_vm8, %v348_v54, 0.0  ;;  %v790_v53 = vadd.s32 16, %v1416_v3  ;;  %v804_v54 = vadd.s32 64, %v1416_v3 }
 0x23c   :  { %351 = vadd.xlane.f32.xlu0 %v350_v56  ;;  %v366_v6 = vpop.permute.xlu1 %365  ;;  %vm797_vm0 = vcmp.eq.s32.totalorder %v1460_v26, %v789_v52 }
 0x23d   :  { %v349_v57 = vmul.f32 %v347_v55, %v347_v55  ;;  %vm812_vm15 = vcmp.eq.s32.totalorder %v1460_v26, %v804_v54  ;;  %vm798_vm2 = vcmp.eq.s32.totalorder %v1460_v26, %v790_v53  ;;  %v1299_v54 = vld [vmem:[%s1621_s6 + $0x8] ss:$0 sps:$4 sm:$0xff]   ;;  %s1363_s6 = smov [#allocation2]  }
 0x23e   :  { %vm820_vm4 = vmor %vm796_vm14, %vm812_vm15  ;;  %vm801_vm14 = vcmp.eq.s32.totalorder %v1460_v26, %v793_v1  ;;  %s1105_s20 = sshll.u32 %s1363_s6, 4  ;;  %s1106_s20 = int_to_ptr.vmem [resolvable:$true] %s1105_s20 }
 0x23f   :  { %v353_v58 = vsel %vm336_vm8, %v349_v57, 0.0  ;;  %v806_v57 = vadd.s32 64, %v790_v53  ;;  %s1332_s23 = scalar_lea.vmem %s1106_s20, 16  ;;  %s1336_s24 = scalar_lea.vmem %s1106_s20, 32 }
 0x240   :  { %354 = vadd.xlane.f32.xlu1 %v353_v58  ;;  %v370_v7 = vpop.permute.xlu1 %369  ;;  %v791_v58 = vadd.s32 24, %v1416_v3  ;;  %p1333_p0 = scmp.ne.s32.totalorder %s1106_s20, %s1332_s23  ;;  %p1337_p1 = scmp.lt.s32.totalorder %s1106_s20, %s1106_s20 }
 0x241   :  { %vm814_vm3 = vcmp.eq.s32.totalorder %v1460_v26, %v806_v57  ;;  %p1338_p2 = scmp.lt.s32.totalorder %s1336_s24, %s1332_s23 }
 0x242   :  { %v807_v59 = vadd.s32 64, %v791_v58  ;;  %vm799_vm7 = vcmp.eq.s32.totalorder %v1460_v26, %v791_v58 }
 0x243   :  { %p1339_p3 = por %p1338_p2, %p1337_p1 }
 0x244   :  { %v376_v8 = vpop.permute.xlu1 %375 }
 0x245   :  { %p1340_p4 = pnand %p1339_p3, %p1333_p0 }
 0x251   :  { %379 = vperm.xlu1 %1287, %v1456_v15  }
 0x252   :  { %529 = vperm.xlu0 %1288, %v1450_v13  }
 0x255   :  { %1289 = vset.pattern.permute.xlu1 %v1360_v48 }
 0x256   :  { %533 = vperm.xlu1 %1289, %v1456_v15   ;;  %1292 = vset.pattern.permute.xlu0 %v1362_v50 }
 0x25a   :  { %538 = vperm.xlu1 %1289, %v1504_v63  }
 0x25e   :  { %543 = vperm.xlu1 %1289, %v269_v2  }
 0x262   :  { %1290 = vset.pattern.permute.xlu1 %v1361_v4 }
 0x263   :  { %858 = vperm.xlu1 %1290, %v1504_v63  }
 0x267   :  { %862 = vperm.xlu1 %1290, %v269_v2  }
 0x26b   :  { %850 = vperm.xlu1 %1290, %v1450_v13  }
 0x26f   :  { %854 = vperm.xlu1 %1290, %v1456_v15  }
 0x273   :  { %1291 = vset.pattern.permute.xlu1 %v1362_v50 }
 0x274   :  { %891 = vperm.xlu1 %1291, %v1504_v63  }
 0x278   :  { %887 = vperm.xlu1 %1291, %v1456_v15   ;;  %v792_v15 = vadd.s32 32, %v1416_v3 }
 0x27a   :  { %v808_v62 = vadd.s32 64, %v792_v15  ;;  %vm800_vm9 = vcmp.eq.s32.totalorder %v1460_v26, %v792_v15 }
 0x27c   :  { %883 = vperm.xlu1 %1291, %v1450_v13   ;;  %vm816_vm10 = vcmp.eq.s32.totalorder %v1460_v26, %v808_v62 }
 0x2c5   :  { %v352_v9 = vpop.xlane.xlu0 %351 }
 0x2c6   :  { %v356_v10 = vmul.f32 0.5, %v352_v9 }
 0x2c8   :  { %v358_v11 = vadd.f32 1e-05, %v356_v10  ;;  %v810_v10 = vadd.s32 64, %v794_v5 }
 0x2c9   :  { %v355_v12 = vpop.xlane.xlu1 %354 }
 0x2ca   :  { %1300 = vrsqrt.f32 %v358_v11  ;;  %v357_v14 = vmul.f32 0.5, %v355_v12 }
 0x2cc   :  { %v359_v16 = vadd.f32 1e-05, %v357_v14  ;;  %v795_v14 = vadd.s32 56, %v1416_v3 }
 0x2cd   :  { %v380_v23 = vpop.permute.xlu1 %379  ;;  %v530_v37 = vpop.permute.xlu0 %529 }
 0x2ce   :  { %1302 = vrsqrt.f32 %v359_v16 }
 0x2d1   :  { %v534_v34 = vpop.permute.xlu1 %533 }
 0x2d5   :  { %v539_v41 = vpop.permute.xlu1 %538 }
 0x2d7   :  { %v1301_v17 = vpop.eup %1300 }
 0x2d8   :  { %v362_v18 = vmul.f32 %v1301_v17, %v346_v51  ;;  %v1254_v51 = vpop.f32.mrf.mxu0 }
 0x2d9   :  { %v544_v47 = vpop.permute.xlu1 %543 }
 0x2da   :  { %v372_v21 = vmul.f32 %v366_v6, %v362_v18  ;;  %v750_v56 = vpop.f32.mrf.mxu0  ;;  %v811_v18 = vadd.s32 64, %v795_v14 }
 0x2db   :  { %v1303_v19 = vpop.eup %1302  ;;  %v828_v61 = vsel %vm820_vm4, %v750_v56, 0.0  ;;  %vm803_vm4 = vcmp.eq.s32.totalorder %v1460_v26, %v795_v14 }
 0x2dc   :  { %v363_v20 = vmul.f32 %v1303_v19, %v347_v55  ;;  %v382_v24 = vadd.f32 %v376_v8, %v372_v21  ;;  %v805_v55 = vadd.s32 64, %v789_v52  ;;  %v1257_v13 = vpop.f32.mrf.mxu0 }
 0x2de   :  { %v373_v22 = vmul.f32 %v370_v7, %v363_v20  ;;  %vm813_vm1 = vcmp.eq.s32.totalorder %v1460_v26, %v805_v55  ;;  %v760_v60 = vpop.f32.mrf.mxu0  ;;  %v809_v7 = vadd.s32 64, %v793_v1 }
 0x2df   :  { %vm821_vm5 = vmor %vm797_vm0, %vm813_vm1  ;;  %vm802_vm0 = vcmp.eq.s32.totalorder %v1460_v26, %v794_v5  ;;  %vm818_vm1 = vcmp.eq.s32.totalorder %v1460_v26, %v810_v10 }
 0x2e0   :  { %v383_v25 = vadd.f32 %v380_v23, %v373_v22  ;;  %v829_v63 = vsel %vm821_vm5, %v1254_v51, 0.0  ;;  %v1260_v4 = vpop.f32.mrf.mxu0  ;;  %vm817_vm15 = vcmp.eq.s32.totalorder %v1460_v26, %v809_v7  ;;  %vm819_vm5 = vcmp.eq.s32.totalorder %v1460_v26, %v811_v18 }
 0x2e1   :  { %v836_v2 = vadd.f32 %v829_v63, %v828_v61 }
 0x2e2   :  { %v388_v27 = vpack.c.bf16 %v383_v25, %v382_v24  ;;  %v770_v8 = vpop.f32.mrf.mxu0 }
 0x2e4   :  { %1236 = vmatprep.subr.bf16.mxu1 %v388_v27  ;;  %v1263_v16 = vpop.f32.mrf.mxu0 }
 0x2e5   :  { %1237 = vmatpush3.bf16.msra.mxu1 %v388_v27 }
 0x2e6   :  { %1242 = vmatprep.subr.msk.mxu1 %vm571_vm6, %v1464_v31  ;;  %v780_v19 = vpop.f32.mrf.mxu0 }
 0x2e8   :  { %1239 = vmatmul.mubr.msk.bf16.vlgmr.msra.gmra.mxu1 %vm472_vm12, %v1297_v28  ;;  %vm824_vm12 = vmor %vm800_vm9, %vm816_vm10  ;;  %v859_v28 = vpop.permute.xlu1 %858 }
 0x2e9   :  { %1243 = vmatpush3.msk.msra.mxu1 %vm571_vm6, %v1464_v31  ;;  %vm822_vm6 = vmor %vm798_vm2, %vm814_vm3  ;;  %v832_v12 = vsel %vm824_vm12, %v770_v8, 0.0 }
 0x2ea   :  { %v830_v0 = vsel %vm822_vm6, %v760_v60, 0.0  ;;  %vm825_vm2 = vmor %vm801_vm14, %vm817_vm15 }
 0x2eb   :  { %v837_v6 = vadd.f32 %v836_v2, %v830_v0  ;;  %vm826_vm3 = vmor %vm802_vm0, %vm818_vm1  ;;  %v833_v20 = vsel %vm825_vm2, %v1260_v4, 0.0  ;;  %vm1084_vm0 = vcmask 1040384   ;;  %vm1097_vm1 = vcmask 0  }
 0x2ec   :  { %v834_v22 = vsel %vm826_vm3, %v780_v19, 0.0  ;;  %vm827_vm6 = vmor %vm803_vm4, %vm819_vm5 }
 0x2ed   :  { %v835_v24 = vsel %vm827_vm6, %v1263_v16, 0.0 }
 0x3a8   :  { %v1240_v35 = vpop.f32.mrf.mxu1 }
 0x3a9   :  { %v522_v42 = vadd.f32 %v1240_v35, %v1234_v29 }
 0x3aa   :  { %v513_v36 = vpop.f32.mrf.mxu1 }
 0x3ab   :  { %v514_v38 = vadd.f32 %v513_v36, %v447_v30  ;;  %v548_v31 = vadd.f32 %v539_v41, %v522_v42 }
 0x3ac   :  { %v1241_v39 = vpop.f32.mrf.mxu1 }
 0x3ad   :  { %v546_v40 = vadd.f32 %v530_v37, %v514_v38  ;;  %v525_v45 = vadd.f32 %v1241_v39, %v1235_v32  ;;  %v863_v32 = vpop.permute.xlu1 %862 }
 0x3ae   :  { %v516_v43 = vpop.f32.mrf.mxu1 }
 0x3af   :  { %v517_v44 = vadd.f32 %v516_v43, %v450_v33  ;;  %1244 = vmatprep.mubr.msk.f32.mxu1 %vm336_vm8, %v546_v40  ;;  %v549_v48 = vadd.f32 %v544_v47, %v525_v45 }
 0x3b1   :  { %v547_v46 = vadd.f32 %v534_v34, %v517_v44  ;;  %v851_v34 = vpop.permute.xlu1 %850 }
 0x3b3   :  { %1245 = vmatmul.mubr.msk.f32.vlgmr.msra.gmra.mxu1 %vm336_vm8, %v547_v46 }
 0x3b4   :  { %1247 = vmatprep.mubr.msk.f32.mxu1 %vm336_vm8, %v548_v31 }
 0x3b5   :  { %v855_v38 = vpop.permute.xlu1 %854 }
 0x3b7   :  { %1248 = vmatmul.mubr.msk.f32.gmra.mxu1 %vm336_vm8, %v549_v48  ;;  %vm815_vm8 = vcmp.eq.s32.totalorder %v1460_v26, %v807_v59 }
 0x3b8   :  { %1268 = vmatprep.mubr.msk.bf16.mxu1 %vm902_vm13, %v1298_v49  ;;  %vm823_vm11 = vmor %vm799_vm7, %vm815_vm8 }
 0x3b9   :  { %v831_v9 = vsel %vm823_vm11, %v1257_v13, 0.0  ;;  %v892_v55 = vpop.permute.xlu1 %891 }
 0x3ba   :  { %v838_v11 = vadd.f32 %v837_v6, %v831_v9 }
 0x3bc   :  { %v839_v17 = vadd.f32 %v838_v11, %v832_v12 }
 0x3bd   :  { %v888_v62 = vpop.permute.xlu1 %887 }
 0x3be   :  { %v840_v21 = vadd.f32 %v839_v17, %v833_v20 }
 0x3c0   :  { %v841_v23 = vadd.f32 %v840_v21, %v834_v22 }
 0x3c2   :  { %v842_v25 = vadd.f32 %v841_v23, %v835_v24 }
 0x3c4   :  { %v843_v27 = vrot.slane %v842_v25, 4 }
 0x3c6   :  { %v844_v29 = vadd.f32 %v843_v27, %v842_v25  ;;  %v884_v25 = vpop.permute.xlu1 %883 }
 0x3c8   :  { %v845_v30 = vrot.slane %v844_v29, 2 }
 0x3ca   :  { %v846_v33 = vadd.f32 %v845_v30, %v844_v29 }
 0x3cc   :  { %v847_v35 = vrot.slane %v846_v33, 1 }
 0x3ce   :  { %v1569_v37 = vadd.f32 %v847_v35, %v846_v33 }
 0x3d0   :  { %v868_v26 = vmul.f32 %v863_v32, %v1569_v37  ;;  %v865_v40 = vmul.f32 %v851_v34, %v1569_v37  ;;  %v867_v42 = vmul.f32 %v859_v28, %v1569_v37  ;;  %v866_v43 = vmul.f32 %v855_v38, %v1569_v37 }
 0x3d1   :  { %vm1039_vm14 = vcmp.gt.f32.partialorder %v1569_v37, 0.999  ;;  %vm1038_vm15 = vcmp.lt.f32.partialorder %v1569_v37, -0.999 }
 0x473   :  { %v1246_v36 = vpop.f32.mrf.mxu1 }
 0x474   :  { %v870_v31 = vadd.f32 %v1246_v36, %v866_v43 }
 0x475   :  { %v641_v39 = vpop.f32.mrf.mxu1 }
 0x476   :  { %v869_v44 = vadd.f32 %v865_v40, %v641_v39  ;;  %v874_v51 = vmax.f32 %v870_v31, 0.0 }
 0x477   :  { %v1249_v41 = vpop.f32.mrf.mxu1 }
 0x478   :  { %v872_v45 = vadd.f32 %v1249_v41, %v868_v26  ;;  %v873_v48 = vmax.f32 %v869_v44, 0.0 }
 0x479   :  { %v651_v46 = vpop.f32.mrf.mxu1 }
 0x47a   :  { %v871_v47 = vadd.f32 %v867_v42, %v651_v46  ;;  %v876_v49 = vmax.f32 %v872_v45, 0.0  ;;  %v880_v53 = vpack.c.bf16 %v874_v51, %v873_v48 }
 0x47c   :  { %v875_v50 = vmax.f32 %v871_v47, 0.0 }
 0x47e   :  { %v881_v52 = vpack.c.bf16 %v876_v49, %v875_v50 }
 0x480   :  { %1264 = vmatprep.subr.bf16.mxu1 %v881_v52 }
 0x481   :  { %1265 = vmatpush3.bf16.msra.mxu1 %v881_v52 }
 0x482   :  { %1266 = vmatprep.subr.bf16.mxu1 %v880_v53 }
 0x485   :  { %1267 = vmatpush3.bf16.msra.mxu1 %v880_v53 }
 0x488   :  { %1269 = vmatmul.mubr.msk.bf16.vlgmr.msra.gmra.mxu1 %vm902_vm13, %v1299_v54  ;;  %vm958_vm13 = vcmp.lt.s32.totalorder %v1416_v3, 4 }
 0x548   :  { %v1270_v56 = vpop.f32.mrf.mxu1 }
 0x549   :  { %v1579_v57 = vadd.f32 %v1270_v56, %v892_v55 }
 0x54a   :  { %v943_v58 = vpop.f32.mrf.mxu1 }
 0x54b   :  { %v957_v13 = vmax.f32 %v1579_v57, -7.0  ;;  %v944_v27 = vadd.f32 %v943_v58, %v884_v25 }
 0x54c   :  { %v1271_v15 = vpop.f32.mrf.mxu1 }
 0x54d   :  { %v961_v59 = vsub.f32 0.0, %v957_v13  ;;  %v1595_v28 = vsel %vm958_vm13, %v944_v27, -1e+30 }
 0x54e   :  { %v946_v61 = vpop.f32.mrf.mxu1  ;;  %v1065_v29 = vrot.slane %v1595_v28, 4 }
 0x54f   :  { %v962_v60 = vmul.f32 1.442695, %v961_v59  ;;  %v947_v63 = vadd.f32 %v946_v61, %v888_v62 }
 0x550   :  { %v1066_v33 = vmax.f32 %v1595_v28, %v1065_v29 }
 0x551   :  { %1304 = vpow2.f32 %v962_v60  ;;  %v960_v0 = vsub.f32 %v1569_v37, %v947_v63 }
 0x552   :  { %v1067_v40 = vrot.slane %v1066_v33, 2 }
 0x553   :  { %v964_v1 = vadd.f32 0.003921569, %v960_v0  ;;  %v1157_v2 = vadd.f32 -0.003921569, %v960_v0 }
 0x554   :  { %v1068_v31 = vmax.f32 %v1066_v33, %v1067_v40 }
 0x556   :  { %v1069_v54 = vrot.slane %v1068_v31, 1 }
 0x558   :  { %v1070_v62 = vmax.f32 %v1068_v31, %v1069_v54 }
 0x55e   :  { %v1305_v4 = vpop.eup %1304 }
 0x55f   :  { %v1585_v5 = vmul.f32 %v1305_v4, %v964_v1  ;;  %v1587_v6 = vmul.f32 %v1305_v4, %v1157_v2  ;;  %v1589_v7 = vmul.f32 %v1305_v4, %v960_v0 }
 0x561   :  { %v968_v8 = vand.u32 2147483647, %v1585_v5  ;;  %v989_v9 = vand.u32 2147483647, %v1587_v6  ;;  %v1016_v12 = vand.u32 2147483647, %v1589_v7  ;;  %v1014_v1 = vsub.f32 %v1589_v7, %v957_v13 }
 0x562   :  { %vm975_vm7 = vcmp.ge.f32.partialorder %v1585_v5, 0.0  ;;  %vm996_vm8 = vcmp.ge.f32.partialorder %v1587_v6, 0.0  ;;  %v1015_v49 = vmax.f32 %v1589_v7, 0.0  ;;  %v999_v4 = vmax.f32 %v1587_v6, 0.0 }
 0x563   :  { %v969_v10 = vsub.f32 0.0, %v968_v8  ;;  %v990_v11 = vsub.f32 0.0, %v989_v9  ;;  %v1017_v17 = vsub.f32 0.0, %v1016_v12  ;;  %v978_v8 = vmax.f32 %v1585_v5, 0.0 }
 0x565   :  { %v970_v14 = vmul.f32 1.442695, %v969_v10  ;;  %v991_v16 = vmul.f32 1.442695, %v990_v11  ;;  %v1018_v18 = vmul.f32 1.442695, %v1017_v17  ;;  %v1071_v10 = vsub.f32 %v1595_v28, %v1070_v62 }
 0x567   :  { %1306 = vpow2.f32 %v970_v14 }
 0x568   :  { %1308 = vpow2.f32 %v991_v16 }
 0x569   :  { %1310 = vpow2.f32 %v1018_v18  ;;  %v1072_v18 = vmul.f32 1.442695, %v1071_v10 }
 0x574   :  { %v1307_v19 = vpop.eup %1306 }
 0x575   :  { %v1309_v20 = vpop.eup %1308  ;;  %v972_v21 = vadd.f32 1.0, %v1307_v19  ;;  %v982_v47 = vmul.f32 -0.5, %v1307_v19  ;;  %v985_v58 = vand.u32 2147483647, %v1307_v19 }
 0x576   :  { %v1311_v22 = vpop.eup %1310  ;;  %v993_v23 = vadd.f32 1.0, %v1309_v20  ;;  %v1003_v45 = vmul.f32 -0.5, %v1309_v20  ;;  %v1006_v56 = vand.u32 2147483647, %v1309_v20 }
 0x577   :  { %1312 = vrcp.f32 %v972_v21  ;;  %v1020_v24 = vadd.f32 1.0, %v1311_v22  ;;  %v1023_v30 = vmul.f32 -0.5, %v1311_v22  ;;  %v1026_v3 = vand.u32 2147483647, %v1311_v22 }
 0x578   :  { %1314 = vrcp.f32 %v993_v23  ;;  %v1004_v52 = vadd.f32 1.0, %v1003_v45  ;;  %v983_v55 = vadd.f32 1.0, %v982_v47  ;;  %vm1007_vm10 = vcmp.lt.f32.partialorder %v1006_v56, 0.0004427343 }
 0x579   :  { %1316 = vlog2.f32 %v1020_v24  ;;  %v1024_v39 = vadd.f32 1.0, %v1023_v30  ;;  %vm1027_vm9 = vcmp.lt.f32.partialorder %v1026_v3, 0.0004427343  ;;  %vm986_vm11 = vcmp.lt.f32.partialorder %v985_v58, 0.0004427343 }
 0x57a   :  { %1318 = vlog2.f32 %v993_v23  ;;  %v1005_v60 = vmul.f32 %v1309_v20, %v1004_v52  ;;  %v984_v63 = vmul.f32 %v1307_v19, %v983_v55 }
 0x57b   :  { %1320 = vlog2.f32 %v972_v21  ;;  %v1025_v44 = vmul.f32 %v1311_v22, %v1024_v39 }
 0x584   :  { %v1313_v32 = vpop.eup %1312 }
 0x585   :  { %v976_v34 = vmul.f32 %v1313_v32, %v1307_v19  ;;  %v1315_v35 = vpop.eup %1314 }
 0x586   :  { %v997_v38 = vmul.f32 %v1315_v35, %v1309_v20  ;;  %v1317_v26 = vpop.eup %1316 }
 0x587   :  { %v977_v36 = vsel %vm975_vm7, %v1313_v32, %v976_v34  ;;  %v1022_v42 = vmul.f32 0.6931472, %v1317_v26  ;;  %v1319_v50 = vpop.eup %1318 }
 0x588   :  { %v998_v41 = vsel %vm996_vm8, %v1315_v35, %v997_v38  ;;  %v1321_v51 = vpop.eup %1320  ;;  %v1002_v15 = vmul.f32 0.6931472, %v1319_v50 }
 0x589   :  { %v1012_v43 = vsub.f32 %v977_v36, %v998_v41  ;;  %v1028_v48 = vsel %vm1027_vm9, %v1025_v44, %v1022_v42  ;;  %v981_v59 = vmul.f32 0.6931472, %v1321_v51 }
 0x58a   :  { %v1029_v53 = vadd.f32 %v1028_v48, %v1015_v49  ;;  %v1008_v0 = vsel %vm1007_vm10, %v1005_v60, %v1002_v15 }
 0x58b   :  { %v1033_v46 = vmax.f32 %v1012_v43, 1e-12  ;;  %v987_v2 = vsel %vm986_vm11, %v984_v63, %v981_v59  ;;  %v1009_v11 = vadd.f32 %v1008_v0, %v999_v4  ;;  %vm1032_vm12 = vcmp.gt.f32.partialorder %v1012_v43, 1e-05 }
 0x58c   :  { %v1030_v61 = vmul.f32 2.0, %v1029_v53  ;;  %v988_v12 = vadd.f32 %v987_v2, %v978_v8 }
 0x58d   :  { %1322 = vlog2.f32 %v1033_v46  ;;  %v1011_v19 = vsub.f32 0.0, %v1009_v11 }
 0x58e   :  { %v1031_v9 = vsub.f32 %v1014_v1, %v1030_v61  ;;  %v1010_v57 = vsub.f32 %v1585_v5, %v988_v12  ;;  %1324 = vpow2.f32 %v1072_v18 }
 0x590   :  { %v1158_v17 = vadd.f32 -4.8481164, %v1031_v9 }
 0x59a   :  { %v1323_v14 = vpop.eup %1322 }
 0x59b   :  { %v1035_v16 = vmul.f32 0.6931472, %v1323_v14  ;;  %v1325_v29 = vpop.eup %1324 }
 0x59c   :  { %v1074_v5 = vrot.slane %v1325_v29, 4 }
 0x59d   :  { %v1037_v20 = vsel %vm1032_vm12, %v1035_v16, %v1158_v17 }
 0x59e   :  { %v1042_v13 = vsel %vm1039_vm14, %v1011_v19, %v1037_v20  ;;  %v1075_v33 = vadd.f32 %v1325_v29, %v1074_v5 }
 0x59f   :  { %v1045_v6 = vsel %vm1038_vm15, %v1010_v57, %v1042_v13 }
 0x5a0   :  { %v1046_v7 = vadd.f32 %v1045_v6, %v1595_v28  ;;  %v1076_v34 = vrot.slane %v1075_v33, 2 }
 0x5a2   :  { %v1047_v21 = vrot.slane %v1046_v7, 4  ;;  %v1077_v35 = vadd.f32 %v1076_v34, %v1075_v33 }
 0x5a4   :  { %v1048_v22 = vmax.f32 %v1046_v7, %v1047_v21  ;;  %v1078_v38 = vrot.slane %v1077_v35, 1 }
 0x5a6   :  { %v1049_v23 = vrot.slane %v1048_v22, 2  ;;  %v1079_v28 = vadd.f32 %v1078_v38, %v1077_v35 }
 0x5a8   :  { %v1050_v24 = vmax.f32 %v1048_v22, %v1049_v23 }
 0x5aa   :  { %v1051_v25 = vrot.slane %v1050_v24, 1 }
 0x5ac   :  { %v1052_v27 = vmax.f32 %v1050_v24, %v1051_v25 }
 0x5ae   :  { %v1053_v30 = vsub.f32 %v1046_v7, %v1052_v27 }
 0x5b0   :  { %v1054_v32 = vmul.f32 1.442695, %v1053_v30 }
 0x5b2   :  { %1326 = vpow2.f32 %v1054_v32 }
 0x5b3   :  { %1328 = vlog2.f32 %v1079_v28 }
 0x5bf   :  { %v1327_v37 = vpop.eup %1326 }
 0x5c0   :  { %v1056_v36 = vrot.slane %v1327_v37, 4  ;;  %v1329_v42 = vpop.eup %1328 }
 0x5c1   :  { %v1081_v43 = vmul.f32 0.6931472, %v1329_v42 }
 0x5c2   :  { %v1057_v39 = vadd.f32 %v1327_v37, %v1056_v36 }
 0x5c3   :  { %v1082_v31 = vadd.f32 %v1081_v43, %v1070_v62 }
 0x5c4   :  { %v1058_v26 = vrot.slane %v1057_v39, 2 }
 0x5c6   :  { %v1059_v3 = vadd.f32 %v1058_v26, %v1057_v39 }
 0x5c8   :  { %v1060_v40 = vrot.slane %v1059_v3, 1 }
 0x5ca   :  { %v1061_v41 = vadd.f32 %v1060_v40, %v1059_v3 }
 0x5cc   :  { %1330 = vlog2.f32 %v1061_v41 }
 0x5d9   :  { %v1331_v44 = vpop.eup %1330 }
 0x5da   :  { %v1063_v45 = vmul.f32 0.6931472, %v1331_v44 }
 0x5dc   :  { %v1064_v46 = vadd.f32 %v1063_v45, %v1052_v27 }
 0x5de   :  { %v1083_v47 = vsub.f32 %v1064_v46, %v1082_v31 }
 0x5e0   :  { %v1085_v48 = vsel %vm1084_vm0, %v1083_v47, 0.0 }
 0x5e1   :  { %1086 = vadd.xlane.f32.xlu1 %v1085_v48 }
 0x66a   :  { %v1087_v49 = vpop.xlane.xlu1 %1086 }
 0x66b   :  { %v1088_v50 = vrot.slane %v1087_v49, 4 }
 0x66d   :  { %v1089_v51 = vadd.f32 %v1088_v50, %v1087_v49 }
 0x66f   :  { %v1090_v52 = vrot.slane %v1089_v51, 2 }
 0x671   :  { %v1091_v53 = vadd.f32 %v1090_v52, %v1089_v51 }
 0x673   :  { %v1092_v54 = vrot.slane %v1091_v53, 1 }
 0x675   :  { %v1093_v55 = vadd.f32 %v1092_v54, %v1091_v53 }
 0x677   :  { %1273 = vpush %v1093_v55 }
 0x6a8   :  { %s1274_s21 = spop %1273 }
 0x6a9   :  { %s1095_s22 = smul.f32 -0.011271055, %s1274_s21 }
 0x6ab   :  { %v1096_v56 = vstv %s1095_s22 }
 0x6ac   :  { %1098 = vst.msk [vmem:[#allocation2] sm:$0x1] %vm1097_vm1, %v1096_v56 }
 0x6ad   :  { %1343 = shalt.err (!%p1340_p4)
}
 0x6ae   :  { %1108 = dma.vmem_to_hbm [thread:$0]  %s1106_s20, 16, %s1623_s8, [#allocation3]  }
 0x6af   :  { %1352 = dma.done.wait [#allocation3], 16  }
 0x6b0   :  { %1353 = vsyncadd [#allocation3], 4294967280 }
 0x6b1   :  { %1112 = vsyncpa [#allocation3], 1 }

</bundles_post_ra>
